<compile_context>
chip_gen: v7x
topology: tpu7x:2x2x1
jax: 0.10.0
libtpu: 0.0.40
codegen_flags: <defaults>
</compile_context>

<pallas_src>
import numpy as np
import jax
import jax.numpy as jnp
from jax.experimental import pallas as pl
from jax.experimental.pallas import tpu as pltpu

C1 = 0.01 ** 2
C2 = 0.03 ** 2
C1_81 = 81.0 * C1          # 1/9 pool normalisation folded into the constants
C2_81 = 81.0 * C2

# Use the MXU reflect-pool matrix whenever the (HW, HW) f32 matrix stays <= 4 MiB.
_MATMUL_POOL_MAX_HW = 1024


# ---------------------------------------------------------------------------
# Reflect-pool matrix (3x3 sum with ReflectionPad2d(1) boundaries)
# ---------------------------------------------------------------------------
def _reflect_sum_1d(n):
    """m[p_out, p_in]: contribution of input position p_in to the width-3 reflect(1)
    *sum* at output position p_out."""
    m = np.zeros((n, n), np.float32)
    for p in range(n):
        for d in (-1, 0, 1):
            q = p + d
            if q < 0:
                q = -q
            elif q >= n:
                q = 2 * n - 2 - q
            m[p, q] += 1.0
    return m


def _reflect_pool_matrix(H, W):
    """(HW, HW) matrix M such that pooled_row_major = plane_row_major @ M gives the
    3x3 reflect-padded SUM (normalisation folded into the SSIM constants)."""
    m = np.kron(_reflect_sum_1d(H), _reflect_sum_1d(W)).T  # index [j_in, j_out]
    return jnp.asarray(m, jnp.float32)


# ---------------------------------------------------------------------------
# Shared SSIM epilogue (unnormalised pooled sums -> per-block partial sum)
# ---------------------------------------------------------------------------
def _ssim_partial_sum(s_x, s_y, s_xx, s_yy, s_xy, out_ref, NC, G):
    # Manual CSE of the mu products; 1/9 factors folded into 81*C1 / 81*C2.
    sxsy = s_x * s_y
    sq = s_x * s_x + s_y * s_y
    num = (2.0 * sxsy + C1_81) * (18.0 * s_xy - 2.0 * sxsy + C2_81)
    den = (sq + C1_81) * (9.0 * (s_xx + s_yy) - sq + C2_81)
    inv = pl.reciprocal(den, approx=True)      # EUP slot (nearly free)
    inv = inv * (2.0 - den * inv)              # one Newton step -> ~f32 accuracy
    val = jnp.clip(0.5 - 0.5 * num * inv, 0.0, 1.0)
    if NC % G != 0:
        # Ragged last block: rows past NC hold stale VMEM data -> mask them out.
        row = pl.program_id(0) * G + jax.lax.broadcasted_iota(jnp.int32, val.shape, 0)
        val = jnp.where(row < NC, val, 0.0)
    # Two-stage reduction (per-row, then across rows) for better f32 accuracy.
    total = jnp.sum(jnp.sum(val, axis=1, keepdims=True))
    out_ref[...] = jnp.broadcast_to(total, out_ref.shape)


# ---------------------------------------------------------------------------
# Kernels
# ---------------------------------------------------------------------------
def _make_matmul_kernel(NC, G):
    def kernel(x_ref, y_ref, m_ref, out_ref):
        x = x_ref[...].astype(jnp.float32)     # in-kernel cast: bf16/f16 read at native width
        y = y_ref[...].astype(jnp.float32)
        m = m_ref[...]

        def pool(a):                            # 3x3 reflect SUM on the MXU
            return jnp.dot(a, m, preferred_element_type=jnp.float32)

        _ssim_partial_sum(pool(x), pool(y), pool(x * x), pool(y * y), pool(x * y),
                          out_ref, NC, G)
    return kernel


def _make_roll_kernel(H, W, NC, G):
    HW = H * W

    def kernel(x_ref, y_ref, out_ref):
        x = x_ref[...].astype(jnp.float32)
        y = y_ref[...].astype(jnp.float32)

        lane = jax.lax.broadcasted_iota(jnp.int32, x.shape, 1)
        col = lane % W
        col_first = col == 0
        col_last = col == (W - 1)
        row_first = lane < W
        row_last = lane >= (HW - W)

        def pool(a):
            # Separable 3x3 reflect SUM via circular lane rolls (XLU) + boundary fix.
            prev = pltpu.roll(a, 1, axis=1)          # (r, c-1) circularly
            nxt = pltpu.roll(a, HW - 1, axis=1)      # (r, c+1) circularly
            left = jnp.where(col_first, nxt, prev)   # reflect: a[-1] := a[1]
            right = jnp.where(col_last, prev, nxt)   # reflect: a[W] := a[W-2]
            s = left + a + right
            up_c = pltpu.roll(s, W, axis=1)          # (r-1, c) circularly
            dn_c = pltpu.roll(s, HW - W, axis=1)     # (r+1, c) circularly
            up = jnp.where(row_first, dn_c, up_c)    # reflect: row -1 := row 1
            dn = jnp.where(row_last, up_c, dn_c)     # reflect: row H := row H-2
            return up + s + dn

        _ssim_partial_sum(pool(x), pool(y), pool(x * x), pool(y * y), pool(x * y),
                          out_ref, NC, G)
    return kernel


# ---------------------------------------------------------------------------
# Block-size / VMEM heuristics
# ---------------------------------------------------------------------------
def _vmem_capacity_bytes():
    try:
        cap = int(pltpu.get_tpu_info().vmem_capacity_bytes)
        if cap > 0:
            return cap
    except Exception:
        pass
    return 64 * 1024 * 1024    # conservative fallback (v7x per-core physical)


def _pick_block_config(NC, HW, use_matmul):
    cap = _vmem_capacity_bytes()
    # Scoped-VMEM budget: <= 75% of physical, hard-capped at 48 MiB
    # (v7x has 64 MiB physical per TC; v5e/v6e have 128 MiB).
    budget = min((cap * 3) // 4, 48 * 1024 * 1024)
    matrix_bytes = 2 * HW * HW * 4 if use_matmul else 0   # double-buffered pool matrix
    # ~24 live f32 (G, HW) arrays: 2x double-buffered inputs (4), five pooled sums,
    # squared/cross products, ssim terms, iota/mask temps, compiler slack.
    live_arrays = 24
    avail = budget - matrix_bytes - (2 << 20)
    g = (avail // (live_arrays * HW * 4)) // 8 * 8
    if g < 8:
        # TODO(synk): add lane-axis (spatial) tiling for planes whose working set does
        # not fit VMEM even at 8 planes per block; fail fast instead of silently spilling.
        raise ValueError(
            f"SSIM pallas kernel: plane size H*W={HW} too large for VMEM budget "
            f"{budget} bytes")
    g = min(g, 1024)
    nc8 = ((NC + 7) // 8) * 8
    g = min(g, nc8)
    if nc8 >= 16:
        # Keep >= 2 grid blocks so dual-TensorCore chips (v7x) get work on both cores.
        g = min(g, max(8, (nc8 // 16) * 8))
    return max(g, 8), budget


# ---------------------------------------------------------------------------
# Public entry point
# ---------------------------------------------------------------------------
def ssim_loss(x, y):
    """x, y: (N, C, H, W). Returns the scalar clamped-SSIM loss (mean), matching the
    PyTorch SSIM module's forward()."""
    N, C, H, W = x.shape
    assert y.shape == x.shape
    assert H >= 2 and W >= 2, "ReflectionPad2d(1) requires H, W >= 2"
    NC, HW = N * C, H * W

    # Free layout change: one image plane per sublane row, lane-dense H*W. No dtype
    # cast here (done in-kernel) and no zero-padding (ragged block masked in-kernel).
    xf = x.reshape(NC, HW)
    yf = y.reshape(NC, HW)

    use_matmul = HW <= _MATMUL_POOL_MAX_HW
    G, vmem_limit = _pick_block_config(NC, HW, use_matmul)
    num_blocks = pl.cdiv(NC, G)

    plane_spec = pl.BlockSpec((G, HW), lambda i: (i, 0))
    in_specs = [plane_spec, plane_spec]
    inputs = [xf, yf]
    if use_matmul:
        # Constant block index -> matrix stays resident in VMEM across all grid steps.
        in_specs.append(pl.BlockSpec((HW, HW), lambda i: (0, 0)))
        inputs.append(_reflect_pool_matrix(H, W))
        kernel = _make_matmul_kernel(NC, G)
    else:
        kernel = _make_roll_kernel(H, W, NC, G)

    partials = pl.pallas_call(
        kernel,
        out_shape=jax.ShapeDtypeStruct((num_blocks, 8, 128), jnp.float32),
        grid_spec=pltpu.PrefetchScalarGridSpec(
            num_scalar_prefetch=0,
            grid=(num_blocks,),
            in_specs=in_specs,
            out_specs=pl.BlockSpec((1, 8, 128), lambda i: (i, 0, 0)),
        ),
        compiler_params=pltpu.CompilerParams(
            # TODO(synk): switch to pltpu.CORE_PARALLEL on v7x (2 TCs); "parallel" kept
            # here for portability across v5e/v6e.
            dimension_semantics=("parallel",),
            vmem_limit_bytes=int(vmem_limit),
        ),
    )(*inputs)

    return jnp.sum(partials[:, 0, 0]) / (N * C * H * W)


# ---------------------------------------------------------------------------
# Pure-JAX reference (mirrors the PyTorch module) for verification
# ---------------------------------------------------------------------------
def _ssim_ref(x, y):
    pad = ((0, 0), (0, 0), (1, 1), (1, 1))
    xp = jnp.pad(x, pad, mode="reflect")
    yp = jnp.pad(y, pad, mode="reflect")

    def pool(a):
        s = jax.lax.reduce_window(a, 0.0, jax.lax.add, (1, 1, 3, 3), (1, 1, 1, 1), "VALID")
        return s / 9.0

    mu_x = pool(xp)
    mu_y = pool(yp)
    sigma_x = pool(xp * xp) - mu_x * mu_x
    sigma_y = pool(yp * yp) - mu_y * mu_y
    sigma_xy = pool(xp * yp) - mu_x * mu_y
    n = (2 * mu_x * mu_y + C1) * (2 * sigma_xy + C2)
    d = (mu_x ** 2 + mu_y ** 2 + C1) * (sigma_x + sigma_y + C2)
    return jnp.mean(jnp.clip((1 - n / d) / 2, 0.0, 1.0))


if __name__ == "__main__":
    key = jax.random.PRNGKey(0)
    kx, ky = jax.random.split(key)
    N, C, H, W = 2, 4, 16, 16
    x = jax.random.uniform(kx, (N, C, H, W), dtype=jnp.float32)
    y = jax.random.uniform(ky, (N, C, H, W), dtype=jnp.float32)

    out = jax.block_until_ready(ssim_loss(x, y))
    ref = jax.block_until_ready(_ssim_ref(x, y))

    assert out.shape == ()
    assert jnp.allclose(out, ref, atol=1e-5, rtol=1e-5), (out, ref)
    print("KERNEL_OK")
</pallas_src>

<mosaic_0001>
module attributes {stable_mosaic.version = 11 : i64} {
  func.func @kernel(%arg0: i32, %arg1: memref<8x256xf32, #tpu.memory_space<vmem>>, %arg2: memref<8x256xf32, #tpu.memory_space<vmem>>, %arg3: memref<256x256xf32, #tpu.memory_space<vmem>>, %arg4: memref<1x8x128xf32, #tpu.memory_space<vmem>>) attributes {dimension_semantics = [#tpu.dimension_semantics<parallel>], iteration_bounds = array<i64: 1>, scalar_prefetch = 0 : i64, scratch_operands = 0 : i64, tpu.core_type = #tpu.core_type<tc>, window_params = [{transform_indices = @transform_0, window_bounds = array<i64: 8, 256>}, {transform_indices = @transform_1, window_bounds = array<i64: 8, 256>}, {pipeline_mode = #tpu.pipeline_mode<synchronous>, transform_indices = @transform_2, window_bounds = array<i64: 256, 256>}, {transform_indices = @transform_3, window_bounds = array<i64: 1, 8, 128>}]} {
    %c0 = arith.constant 0 : index
    %c0_0 = arith.constant 0 : index
    %0 = vector.load %arg1[%c0, %c0_0] : memref<8x256xf32, #tpu.memory_space<vmem>>, vector<8x256xf32>
    %c0_1 = arith.constant 0 : index
    %c0_2 = arith.constant 0 : index
    %1 = vector.load %arg2[%c0_1, %c0_2] : memref<8x256xf32, #tpu.memory_space<vmem>>, vector<8x256xf32>
    %c0_3 = arith.constant 0 : index
    %c0_4 = arith.constant 0 : index
    %2 = vector.load %arg3[%c0_3, %c0_4] : memref<256x256xf32, #tpu.memory_space<vmem>>, vector<256x256xf32>
    %cst = arith.constant dense<0.000000e+00> : vector<8x256xf32>
    %3 = tpu.matmul %0, %2, %cst {dimension_numbers = #tpu.dot_dimension_numbers<[1], [0], [0], [1], [0, 0, 1, 1], [], []>} : vector<8x256xf32>, vector<256x256xf32>, vector<8x256xf32> -> vector<8x256xf32>
    %cst_5 = arith.constant dense<0.000000e+00> : vector<8x256xf32>
    %4 = tpu.matmul %1, %2, %cst_5 {dimension_numbers = #tpu.dot_dimension_numbers<[1], [0], [0], [1], [0, 0, 1, 1], [], []>} : vector<8x256xf32>, vector<256x256xf32>, vector<8x256xf32> -> vector<8x256xf32>
    %5 = arith.mulf %0, %0 : vector<8x256xf32>
    %cst_6 = arith.constant dense<0.000000e+00> : vector<8x256xf32>
    %6 = tpu.matmul %5, %2, %cst_6 {dimension_numbers = #tpu.dot_dimension_numbers<[1], [0], [0], [1], [0, 0, 1, 1], [], []>} : vector<8x256xf32>, vector<256x256xf32>, vector<8x256xf32> -> vector<8x256xf32>
    %7 = arith.mulf %1, %1 : vector<8x256xf32>
    %cst_7 = arith.constant dense<0.000000e+00> : vector<8x256xf32>
    %8 = tpu.matmul %7, %2, %cst_7 {dimension_numbers = #tpu.dot_dimension_numbers<[1], [0], [0], [1], [0, 0, 1, 1], [], []>} : vector<8x256xf32>, vector<256x256xf32>, vector<8x256xf32> -> vector<8x256xf32>
    %9 = arith.mulf %0, %1 : vector<8x256xf32>
    %cst_8 = arith.constant dense<0.000000e+00> : vector<8x256xf32>
    %10 = tpu.matmul %9, %2, %cst_8 {dimension_numbers = #tpu.dot_dimension_numbers<[1], [0], [0], [1], [0, 0, 1, 1], [], []>} : vector<8x256xf32>, vector<256x256xf32>, vector<8x256xf32> -> vector<8x256xf32>
    %11 = arith.mulf %3, %4 : vector<8x256xf32>
    %12 = arith.mulf %3, %3 : vector<8x256xf32>
    %13 = arith.mulf %4, %4 : vector<8x256xf32>
    %14 = arith.addf %12, %13 : vector<8x256xf32>
    %cst_9 = arith.constant 2.000000e+00 : f32
    %15 = vector.broadcast %cst_9 : f32 to vector<8x256xf32>
    %16 = arith.mulf %15, %11 : vector<8x256xf32>
    %cst_10 = arith.constant 8.100000e-03 : f32
    %17 = vector.broadcast %cst_10 : f32 to vector<8x256xf32>
    %18 = arith.addf %16, %17 : vector<8x256xf32>
    %cst_11 = arith.constant 1.800000e+01 : f32
    %19 = vector.broadcast %cst_11 : f32 to vector<8x256xf32>
    %20 = arith.mulf %19, %10 : vector<8x256xf32>
    %cst_12 = arith.constant 2.000000e+00 : f32
    %21 = vector.broadcast %cst_12 : f32 to vector<8x256xf32>
    %22 = arith.mulf %21, %11 : vector<8x256xf32>
    %23 = arith.subf %20, %22 : vector<8x256xf32>
    %cst_13 = arith.constant 7.290000e-02 : f32
    %24 = vector.broadcast %cst_13 : f32 to vector<8x256xf32>
    %25 = arith.addf %23, %24 : vector<8x256xf32>
    %26 = arith.mulf %18, %25 : vector<8x256xf32>
    %cst_14 = arith.constant 8.100000e-03 : f32
    %27 = vector.broadcast %cst_14 : f32 to vector<8x256xf32>
    %28 = arith.addf %14, %27 : vector<8x256xf32>
    %29 = arith.addf %6, %8 : vector<8x256xf32>
    %cst_15 = arith.constant 9.000000e+00 : f32
    %30 = vector.broadcast %cst_15 : f32 to vector<8x256xf32>
    %31 = arith.mulf %30, %29 : vector<8x256xf32>
    %32 = arith.subf %31, %14 : vector<8x256xf32>
    %cst_16 = arith.constant 7.290000e-02 : f32
    %33 = vector.broadcast %cst_16 : f32 to vector<8x256xf32>
    %34 = arith.addf %32, %33 : vector<8x256xf32>
    %35 = arith.mulf %28, %34 : vector<8x256xf32>
    %36 = tpu.reciprocal %35 {approx = true} : vector<8x256xf32> -> vector<8x256xf32>
    %37 = arith.mulf %35, %36 : vector<8x256xf32>
    %cst_17 = arith.constant 2.000000e+00 : f32
    %38 = vector.broadcast %cst_17 : f32 to vector<8x256xf32>
    %39 = arith.subf %38, %37 : vector<8x256xf32>
    %40 = arith.mulf %36, %39 : vector<8x256xf32>
    %cst_18 = arith.constant 5.000000e-01 : f32
    %41 = vector.broadcast %cst_18 : f32 to vector<8x256xf32>
    %42 = arith.mulf %41, %26 : vector<8x256xf32>
    %43 = arith.mulf %42, %40 : vector<8x256xf32>
    %cst_19 = arith.constant 5.000000e-01 : f32
    %44 = vector.broadcast %cst_19 : f32 to vector<8x256xf32>
    %45 = arith.subf %44, %43 : vector<8x256xf32>
    %cst_20 = arith.constant 0.000000e+00 : f32
    %cst_21 = arith.constant 1.000000e+00 : f32
    %46 = vector.broadcast %cst_20 : f32 to vector<8x256xf32>
    %47 = arith.maximumf %46, %45 : vector<8x256xf32>
    %48 = vector.broadcast %cst_21 : f32 to vector<8x256xf32>
    %49 = arith.minimumf %48, %47 : vector<8x256xf32>
    %cst_22 = arith.constant dense<0.000000e+00> : vector<8xf32>
    %50 = vector.multi_reduction <add>, %49, %cst_22 [1] : vector<8x256xf32> to vector<8xf32>
    %51 = vector.shape_cast %50 : vector<8xf32> to vector<8x1xf32>
    %52 = vector.shape_cast %51 : vector<8x1xf32> to vector<1x8x1xf32>
    %cst_23 = arith.constant dense<0.000000e+00> : vector<1xf32>
    %53 = vector.multi_reduction <add>, %52, %cst_23 [1, 2] : vector<1x8x1xf32> to vector<1xf32>
    %54 = vector.shape_cast %53 : vector<1xf32> to vector<1x1x1xf32>
    %55 = vector.extract %54[0, 0, 0] : f32 from vector<1x1x1xf32>
    %56 = vector.broadcast %55 : f32 to vector<1x8x128xf32>
    %c0_24 = arith.constant 0 : index
    %c0_25 = arith.constant 0 : index
    %c0_26 = arith.constant 0 : index
    %57 = vector.load %arg4[%c0_24, %c0_25, %c0_26] : memref<1x8x128xf32, #tpu.memory_space<vmem>>, vector<1x8x128xf32>
    tpu.vector_store %arg4[%c0_24, %c0_25, %c0_26], %56 {strides = array<i32>} : memref<1x8x128xf32, #tpu.memory_space<vmem>>, vector<1x8x128xf32>,
    return
  }
  func.func @transform_0(%arg0: i32) -> (i32, i32) {
    %c0_i32 = arith.constant 0 : i32
    %c0_i32_0 = arith.constant 0 : i32
    return %arg0, %c0_i32 : i32, i32
  }
  func.func @transform_1(%arg0: i32) -> (i32, i32) {
    %c0_i32 = arith.constant 0 : i32
    %c0_i32_0 = arith.constant 0 : i32
    return %arg0, %c0_i32 : i32, i32
  }
  func.func @transform_2(%arg0: i32) -> (i32, i32) {
    %c0_i32 = arith.constant 0 : i32
    %c0_i32_0 = arith.constant 0 : i32
    %c0_i32_1 = arith.constant 0 : i32
    return %c0_i32, %c0_i32_0 : i32, i32
  }
  func.func @transform_3(%arg0: i32) -> (i32, i32, i32) {
    %c0_i32 = arith.constant 0 : i32
    %c0_i32_0 = arith.constant 0 : i32
    %c0_i32_1 = arith.constant 0 : i32
    return %arg0, %c0_i32, %c0_i32_0 : i32, i32, i32
  }
}

</mosaic_0001>

<bundles_post_ra>
// kernel: tpu_custom_call.1
= control target key start
LH: loop header
LB: loop body
LE: loop exit
PB: predicated region body
PF: predicated region fallthrough
CT: control target
= control target key end

     0   :  { %8 = vsyncpa [#allocation3], 0  ;;  %s1311_s0 = inlined_call_operand.hbm [shape: f32[8,256], index: 0, kind: input, shape index: {}]   ;;  %s1312_s1 = inlined_call_operand.hbm [shape: f32[8,256], index: 1, kind: input, shape index: {}]   ;;  %s1313_s2 = inlined_call_operand.hbm [shape: f32[256,256], index: 2, kind: input, shape index: {}]   ;;  %s1314_s3 = inlined_call_operand.hbm [shape: f32[1,8,128], index: 3, kind: output, shape index: {}]  }
   0x1   :  { %9 = vsyncpa [#allocation6], 0 }
   0x2   :  { %10 = vsyncpa [#allocation4], 0  ;;  %s989_s12 = smov [#allocation5]   ;;  %s990_s14 = smov [#allocation2]  }
   0x3   :  { %s27_s13 = sshll.u32 %s989_s12, 4  ;;  %s17_s15 = sshll.u32 %s990_s14, 4  ;;  %s28_s13 = int_to_ptr.vmem [resolvable:$true] %s27_s13  ;;  %s18_s15 = int_to_ptr.vmem [resolvable:$true] %s17_s15 }
   0x4   :  { %s895_s18 = scalar_lea.hbm %s1312_s1, 256 }
   0x5   :  { %p896_p0 = scmp.ne.s32.totalorder %s1312_s1, %s895_s18  ;;  %p899_p1 = scmp.lt.u32.totalorder %s895_s18, %s1312_s1 }
   0x7   :  { %p901_p2 = pnand %p899_p1, %p896_p0 }
   0x9   :  { %904 = shalt.err (!%p901_p2)
}
   0xa   :  { %s905_s23 = scalar_lea.vmem %s28_s13, 256  ;;  %p910_p4 = scmp.lt.s32.totalorder %s28_s13, %s28_s13 }
   0xb   :  { %p906_p3 = scmp.ne.s32.totalorder %s28_s13, %s905_s23  ;;  %p911_p5 = scmp.lt.s32.totalorder %s905_s23, %s905_s23 }
   0xd   :  { %p912_p6 = por %p911_p5, %p910_p4 }
   0xf   :  { %p913_p7 = pnand %p912_p6, %p906_p3 }
  0x11   :  { %916 = shalt.err (!%p913_p7)
}
  0x12   :  { %30 = dma.hbm_to_vmem [thread:$0]  %s1312_s1, 256, %s28_s13, [#allocation6]  }
  0x13   :  { %s917_s28 = scalar_lea.hbm %s1311_s0, 256 }
  0x14   :  { %p918_p8 = scmp.ne.s32.totalorder %s1311_s0, %s917_s28  ;;  %p921_p9 = scmp.lt.u32.totalorder %s917_s28, %s1311_s0 }
  0x16   :  { %p923_p10 = pnand %p921_p9, %p918_p8 }
  0x18   :  { %926 = shalt.err (!%p923_p10)
}
  0x19   :  { %s927_s6 = scalar_lea.vmem %s18_s15, 256  ;;  %p932_p12 = scmp.lt.s32.totalorder %s18_s15, %s18_s15 }
  0x1a   :  { %p928_p11 = scmp.ne.s32.totalorder %s18_s15, %s927_s6  ;;  %p933_p13 = scmp.lt.s32.totalorder %s927_s6, %s927_s6 }
  0x1c   :  { %p934_p0 = por %p933_p13, %p932_p12 }
  0x1e   :  { %p935_p1 = pnand %p934_p0, %p928_p11 }
  0x20   :  { %938 = shalt.err (!%p935_p1)
}
  0x21   :  { %20 = dma.hbm_to_vmem [thread:$0]  %s1311_s0, 256, %s18_s15, [#allocation3]  }
  0x22   :  { %s991_s8 = smov [#allocation7]   ;;  %s939_s12 = scalar_lea.hbm %s1313_s2, 8192 }
  0x23   :  { %s36_s9 = sshll.u32 %s991_s8, 4  ;;  %p940_p2 = scmp.ne.s32.totalorder %s1313_s2, %s939_s12  ;;  %s37_s9 = int_to_ptr.vmem [resolvable:$true] %s36_s9 }
  0x24   :  { %p943_p3 = scmp.lt.u32.totalorder %s939_s12, %s1313_s2 }
  0x26   :  { %p945_p4 = pnand %p943_p3, %p940_p2 }
  0x28   :  { %948 = shalt.err (!%p945_p4)
}
  0x29   :  { %s949_s18 = scalar_lea.vmem %s37_s9, 8192  ;;  %p954_p6 = scmp.lt.s32.totalorder %s37_s9, %s37_s9 }
  0x2a   :  { %p950_p5 = scmp.ne.s32.totalorder %s37_s9, %s949_s18  ;;  %p955_p7 = scmp.lt.s32.totalorder %s949_s18, %s949_s18 }
  0x2c   :  { %p956_p8 = por %p955_p7, %p954_p6 }
  0x2e   :  { %p957_p9 = pnand %p956_p8, %p950_p5 }
  0x30   :  { %960 = shalt.err (!%p957_p9)
}
  0x31   :  { %s992_s0 = smov 256   ;;  %s993_s15 = smov 16  }
  0x32   :  { %42 = dma.hbm_to_vmem [thread:$0]  %s1313_s2, 8192, %s37_s9, [#allocation6], %s992_s0, %s992_s0, %s993_s15  }
  0x33   :  { %983 = dma.done.wait [#allocation3], 256  }
  0x34   :  { %984 = vsyncadd [#allocation3], 4294967040 }
  0x35   :  { %985 = dma.done.wait [#allocation6], 8448  }
  0x36   :  { %986 = vsyncadd [#allocation6], 4294958848  ;;  %v57_v0 = vld [vmem:[#allocation7 + $0x8] sm:$0xff]  ;;  %v59_v1 = vld [vmem:[#allocation7 + $0x18] sm:$0xff]  ;;  %vm532_vm0 = vcmask 7168   ;;  %s994_s2 = smov [#allocation8]  }
  0x37   :  { %v56_v2 = vld [vmem:[#allocation7] sm:$0xff]  ;;  %v1051_v3 = vpack.c.bf16 %v59_v1, %v57_v0  ;;  %v58_v4 = vld [vmem:[#allocation7 + $0x10] sm:$0xff]  ;;  %v61_v5 = vld [vmem:[#allocation7 + $0x28] sm:$0xff]  ;;  %s551_s21 = sshll.u32 %s994_s2, 4  ;;  %s552_s21 = int_to_ptr.vmem [resolvable:$true] %s551_s21 }
  0x38   :  { %v63_v6 = vld [vmem:[#allocation7 + $0x38] sm:$0xff]  ;;  %v1053_v7 = vpack.c.bf16 %v58_v4, %v56_v2  ;;  %v60_v9 = vld [vmem:[#allocation7 + $0x20] sm:$0xff]  ;;  %v62_v10 = vld [vmem:[#allocation7 + $0x30] sm:$0xff]  ;;  %s961_s23 = scalar_lea.vmem %s552_s21, 128  ;;  %p966_p11 = scmp.lt.s32.totalorder %s552_s21, %s552_s21 }
  0x39   :  { %v1055_v8 = vpack.c.bf16 %v63_v6, %v61_v5  ;;  %v65_v11 = vld [vmem:[#allocation7 + $0x48] sm:$0xff]  ;;  %562 = vmatprep.subr.bf16.mxu0 %v1051_v3  ;;  %626 = vmatprep.subr.bf16.mxu1 %v1051_v3  ;;  %v67_v12 = vld [vmem:[#allocation7 + $0x58] sm:$0xff]  ;;  %v1061_v13 = vpack.c.bf16 %v62_v10, %v60_v9  ;;  %v64_v15 = vld [vmem:[#allocation7 + $0x40] sm:$0xff]  ;;  %p962_p10 = scmp.ne.s32.totalorder %s552_s21, %s961_s23  ;;  %p967_p12 = scmp.lt.s32.totalorder %s961_s23, %s961_s23 }
  0x3a   :  { %564 = vmatpush1.bf16.msra.mxu0 %v1053_v7  ;;  %628 = vmatpush1.bf16.msra.mxu1 %v1053_v7  ;;  %v1065_v14 = vpack.c.bf16 %v67_v12, %v65_v11  ;;  %v66_v16 = vld [vmem:[#allocation7 + $0x50] sm:$0xff]  ;;  %v69_v17 = vld [vmem:[#allocation7 + $0x68] sm:$0xff]  ;;  %v71_v18 = vld [vmem:[#allocation7 + $0x78] sm:$0xff] }
  0x3b   :  { %566 = vmatprep.subr.bf16.mxu0 %v1055_v8  ;;  %630 = vmatprep.subr.bf16.mxu1 %v1055_v8  ;;  %v1069_v19 = vpack.c.bf16 %v66_v16, %v64_v15  ;;  %v1073_v20 = vpack.c.bf16 %v71_v18, %v69_v17  ;;  %v68_v21 = vld [vmem:[#allocation7 + $0x60] sm:$0xff]  ;;  %v70_v22 = vld [vmem:[#allocation7 + $0x70] sm:$0xff]  ;;  %v73_v23 = vld [vmem:[#allocation7 + $0x88] sm:$0xff]  ;;  %p968_p13 = por %p967_p12, %p966_p11 }
  0x3c   :  { %v75_v24 = vld [vmem:[#allocation7 + $0x98] sm:$0xff]  ;;  %v1077_v25 = vpack.c.bf16 %v70_v22, %v68_v21  ;;  %v72_v27 = vld [vmem:[#allocation7 + $0x80] sm:$0xff]  ;;  %v74_v28 = vld [vmem:[#allocation7 + $0x90] sm:$0xff] }
  0x3d   :  { %v1081_v26 = vpack.c.bf16 %v75_v24, %v73_v23  ;;  %v77_v29 = vld [vmem:[#allocation7 + $0xa8] sm:$0xff]  ;;  %v79_v30 = vld [vmem:[#allocation7 + $0xb8] sm:$0xff]  ;;  %v1085_v31 = vpack.c.bf16 %v74_v28, %v72_v27  ;;  %v76_v33 = vld [vmem:[#allocation7 + $0xa0] sm:$0xff]  ;;  %p969_p0 = pnand %p968_p13, %p962_p10 }
  0x3e   :  { %568 = vmatpush1.bf16.msra.mxu0 %v1061_v13  ;;  %632 = vmatpush1.bf16.msra.mxu1 %v1061_v13  ;;  %v1089_v32 = vpack.c.bf16 %v79_v30, %v77_v29  ;;  %v78_v34 = vld [vmem:[#allocation7 + $0xb0] sm:$0xff]  ;;  %v81_v35 = vld [vmem:[#allocation7 + $0xc8] sm:$0xff]  ;;  %v83_v36 = vld [vmem:[#allocation7 + $0xd8] sm:$0xff] }
  0x3f   :  { %570 = vmatprep.subr.bf16.mxu0 %v1065_v14  ;;  %634 = vmatprep.subr.bf16.mxu1 %v1065_v14  ;;  %v1093_v37 = vpack.c.bf16 %v78_v34, %v76_v33  ;;  %v80_v38 = vld [vmem:[#allocation7 + $0xc0] sm:$0xff]  ;;  %v1097_v39 = vpack.c.bf16 %v83_v36, %v81_v35  ;;  %v82_v40 = vld [vmem:[#allocation7 + $0xd0] sm:$0xff]  ;;  %v1099_v41 = vld [vmem:[#allocation2 + $0x8] sm:$0xff] }
  0x40   :  { %v1101_v42 = vld [vmem:[#allocation5 + $0x8] sm:$0xff]  ;;  %v85_v43 = vld [vmem:[#allocation7 + $0xe8] sm:$0xff]  ;;  %184 = vmatprep.mubr.f32.mxu0 %v1099_v41  ;;  %v1107_v45 = vpack.c.bf16 %v82_v40, %v80_v38  ;;  %v84_v47 = vld [vmem:[#allocation7 + $0xe0] sm:$0xff] }
  0x41   :  { %v87_v44 = vld [vmem:[#allocation7 + $0xf8] sm:$0xff]  ;;  %255 = vmatprep.mubr.f32.mxu1 %v1101_v42  ;;  %v86_v48 = vld [vmem:[#allocation7 + $0xf0] sm:$0xff]  ;;  %v89_v49 = vld [vmem:[#allocation7 + $0x108] sm:$0xff] }
  0x42   :  { %572 = vmatpush1.bf16.msra.mxu0 %v1069_v19  ;;  %636 = vmatpush1.bf16.msra.mxu1 %v1069_v19  ;;  %v1111_v46 = vpack.c.bf16 %v87_v44, %v85_v43  ;;  %v91_v50 = vld [vmem:[#allocation7 + $0x118] sm:$0xff]  ;;  %v1115_v51 = vpack.c.bf16 %v86_v48, %v84_v47  ;;  %v88_v53 = vld [vmem:[#allocation7 + $0x100] sm:$0xff]  ;;  %v90_v54 = vld [vmem:[#allocation7 + $0x110] sm:$0xff] }
  0x43   :  { %574 = vmatprep.subr.bf16.mxu0 %v1073_v20  ;;  %638 = vmatprep.subr.bf16.mxu1 %v1073_v20  ;;  %v1119_v52 = vpack.c.bf16 %v91_v50, %v89_v49  ;;  %v93_v55 = vld [vmem:[#allocation7 + $0x128] sm:$0xff]  ;;  %v95_v56 = vld [vmem:[#allocation7 + $0x138] sm:$0xff]  ;;  %v1123_v57 = vpack.c.bf16 %v90_v54, %v88_v53  ;;  %v92_v59 = vld [vmem:[#allocation7 + $0x120] sm:$0xff] }
  0x44   :  { %v1127_v58 = vpack.c.bf16 %v95_v56, %v93_v55  ;;  %v94_v60 = vld [vmem:[#allocation7 + $0x130] sm:$0xff]  ;;  %v97_v61 = vld [vmem:[#allocation7 + $0x148] sm:$0xff]  ;;  %v99_v62 = vld [vmem:[#allocation7 + $0x158] sm:$0xff]  ;;  %v338_v55 = vmul.f32 %v1101_v42, %v1099_v41  ;;  %v265_v56 = vmul.f32 %v1101_v42, %v1101_v42 }
  0x45   :  { %v1131_v63 = vpack.c.bf16 %v94_v60, %v92_v59  ;;  %v1135_v0 = vpack.c.bf16 %v99_v62, %v97_v61  ;;  %v96_v1 = vld [vmem:[#allocation7 + $0x140] sm:$0xff]  ;;  %v98_v2 = vld [vmem:[#allocation7 + $0x150] sm:$0xff]  ;;  %v101_v4 = vld [vmem:[#allocation7 + $0x168] sm:$0xff]  ;;  %v263_v60 = vmul.f32 %v1099_v41, %v1099_v41 }
  0x46   :  { %576 = vmatpush1.bf16.msra.mxu0 %v1077_v25  ;;  %640 = vmatpush1.bf16.msra.mxu1 %v1077_v25  ;;  %v103_v5 = vld [vmem:[#allocation7 + $0x178] sm:$0xff]  ;;  %v1139_v6 = vpack.c.bf16 %v98_v2, %v96_v1  ;;  %v100_v10 = vld [vmem:[#allocation7 + $0x160] sm:$0xff]  ;;  %v102_v11 = vld [vmem:[#allocation7 + $0x170] sm:$0xff] }
  0x47   :  { %578 = vmatprep.subr.bf16.mxu0 %v1081_v26  ;;  %642 = vmatprep.subr.bf16.mxu1 %v1081_v26  ;;  %v1143_v9 = vpack.c.bf16 %v103_v5, %v101_v4  ;;  %v105_v12 = vld [vmem:[#allocation7 + $0x188] sm:$0xff]  ;;  %v107_v15 = vld [vmem:[#allocation7 + $0x198] sm:$0xff]  ;;  %v1147_v16 = vpack.c.bf16 %v102_v11, %v100_v10  ;;  %v104_v18 = vld [vmem:[#allocation7 + $0x180] sm:$0xff] }
  0x48   :  { %v1151_v17 = vpack.c.bf16 %v107_v15, %v105_v12  ;;  %v106_v21 = vld [vmem:[#allocation7 + $0x190] sm:$0xff]  ;;  %v109_v22 = vld [vmem:[#allocation7 + $0x1a8] sm:$0xff]  ;;  %v111_v23 = vld [vmem:[#allocation7 + $0x1b8] sm:$0xff] }
  0x49   :  { %v1155_v24 = vpack.c.bf16 %v106_v21, %v104_v18  ;;  %v1159_v27 = vpack.c.bf16 %v111_v23, %v109_v22  ;;  %v108_v28 = vld [vmem:[#allocation7 + $0x1a0] sm:$0xff]  ;;  %v110_v29 = vld [vmem:[#allocation7 + $0x1b0] sm:$0xff]  ;;  %v113_v30 = vld [vmem:[#allocation7 + $0x1c8] sm:$0xff] }
  0x4a   :  { %580 = vmatpush1.bf16.msra.mxu0 %v1085_v31  ;;  %644 = vmatpush1.bf16.msra.mxu1 %v1085_v31  ;;  %v115_v33 = vld [vmem:[#allocation7 + $0x1d8] sm:$0xff]  ;;  %v1163_v34 = vpack.c.bf16 %v110_v29, %v108_v28  ;;  %v112_v36 = vld [vmem:[#allocation7 + $0x1c0] sm:$0xff]  ;;  %v114_v38 = vld [vmem:[#allocation7 + $0x1d0] sm:$0xff] }
  0x4b   :  { %582 = vmatprep.subr.bf16.mxu0 %v1089_v32  ;;  %646 = vmatprep.subr.bf16.mxu1 %v1089_v32  ;;  %v1167_v35 = vpack.c.bf16 %v115_v33, %v113_v30  ;;  %v117_v40 = vld [vmem:[#allocation7 + $0x1e8] sm:$0xff]  ;;  %v119_v43 = vld [vmem:[#allocation7 + $0x1f8] sm:$0xff]  ;;  %v1171_v44 = vpack.c.bf16 %v114_v38, %v112_v36  ;;  %v116_v48 = vld [vmem:[#allocation7 + $0x1e0] sm:$0xff] }
  0x4c   :  { %v1175_v47 = vpack.c.bf16 %v119_v43, %v117_v40  ;;  %v118_v49 = vld [vmem:[#allocation7 + $0x1f0] sm:$0xff]  ;;  %v1185_v53 = vld [vmem:[#allocation2] sm:$0xff] }
  0x4d   :  { %v1179_v50 = vpack.c.bf16 %v118_v49, %v116_v48  ;;  %v1187_v54 = vld [vmem:[#allocation5] sm:$0xff] }
  0x4e   :  { %584 = vmatpush1.bf16.msra.mxu0 %v1093_v37  ;;  %648 = vmatpush1.bf16.msra.mxu1 %v1093_v37  ;;  %v264_v42 = vmul.f32 %v1187_v54, %v1187_v54  ;;  %v337_v59 = vmul.f32 %v1187_v54, %v1185_v53 }
  0x4f   :  { %586 = vmatprep.subr.bf16.mxu0 %v1097_v39  ;;  %650 = vmatprep.subr.bf16.mxu1 %v1097_v39 }
  0x52   :  { %588 = vmatpush1.bf16.msra.mxu0 %v1107_v45  ;;  %652 = vmatpush1.bf16.msra.mxu1 %v1107_v45 }
  0x53   :  { %590 = vmatprep.subr.bf16.mxu0 %v1111_v46  ;;  %654 = vmatprep.subr.bf16.mxu1 %v1111_v46 }
  0x56   :  { %592 = vmatpush1.bf16.msra.mxu0 %v1115_v51  ;;  %656 = vmatpush1.bf16.msra.mxu1 %v1115_v51 }
  0x57   :  { %594 = vmatprep.subr.bf16.mxu0 %v1119_v52  ;;  %658 = vmatprep.subr.bf16.mxu1 %v1119_v52 }
  0x5a   :  { %596 = vmatpush1.bf16.msra.mxu0 %v1123_v57  ;;  %660 = vmatpush1.bf16.msra.mxu1 %v1123_v57 }
  0x5b   :  { %598 = vmatprep.subr.bf16.mxu0 %v1127_v58  ;;  %662 = vmatprep.subr.bf16.mxu1 %v1127_v58 }
  0x5e   :  { %600 = vmatpush1.bf16.msra.mxu0 %v1131_v63  ;;  %664 = vmatpush1.bf16.msra.mxu1 %v1131_v63 }
  0x5f   :  { %602 = vmatprep.subr.bf16.mxu0 %v1135_v0  ;;  %666 = vmatprep.subr.bf16.mxu1 %v1135_v0 }
  0x62   :  { %604 = vmatpush1.bf16.msra.mxu0 %v1139_v6  ;;  %668 = vmatpush1.bf16.msra.mxu1 %v1139_v6 }
  0x63   :  { %606 = vmatprep.subr.bf16.mxu0 %v1143_v9  ;;  %670 = vmatprep.subr.bf16.mxu1 %v1143_v9 }
  0x66   :  { %608 = vmatpush1.bf16.msra.mxu0 %v1147_v16  ;;  %672 = vmatpush1.bf16.msra.mxu1 %v1147_v16 }
  0x67   :  { %610 = vmatprep.subr.bf16.mxu0 %v1151_v17  ;;  %674 = vmatprep.subr.bf16.mxu1 %v1151_v17 }
  0x6a   :  { %612 = vmatpush1.bf16.msra.mxu0 %v1155_v24  ;;  %676 = vmatpush1.bf16.msra.mxu1 %v1155_v24 }
  0x6b   :  { %614 = vmatprep.subr.bf16.mxu0 %v1159_v27  ;;  %678 = vmatprep.subr.bf16.mxu1 %v1159_v27 }
  0x6e   :  { %616 = vmatpush1.bf16.msra.mxu0 %v1163_v34  ;;  %680 = vmatpush1.bf16.msra.mxu1 %v1163_v34 }
  0x6f   :  { %618 = vmatprep.subr.bf16.mxu0 %v1167_v35  ;;  %682 = vmatprep.subr.bf16.mxu1 %v1167_v35 }
  0x72   :  { %620 = vmatpush1.bf16.msra.mxu0 %v1171_v44  ;;  %684 = vmatpush1.bf16.msra.mxu1 %v1171_v44 }
  0x73   :  { %622 = vmatprep.subr.bf16.mxu0 %v1175_v47  ;;  %686 = vmatprep.subr.bf16.mxu1 %v1175_v47 }
  0x76   :  { %624 = vmatpush1.bf16.msra.mxu0 %v1179_v50  ;;  %688 = vmatpush1.bf16.msra.mxu1 %v1179_v50 }
  0x77   :  { %690 = vmatprep.subr.bf16.mxu0 %v1051_v3  ;;  %754 = vmatprep.subr.bf16.mxu1 %v1051_v3 }
  0x79   :  { %185 = vmatmul.mubr.f32.vlgmr.msra.gmra.mrb[0].mxu0 %v1185_v53  ;;  %256 = vmatmul.mubr.f32.vlgmr.msra.gmra.mrb[0].mxu1 %v1187_v54 }
  0x7a   :  { %692 = vmatpush1.bf16.msra.mxu0 %v1053_v7  ;;  %756 = vmatpush1.bf16.msra.mxu1 %v1053_v7 }
  0x7b   :  { %694 = vmatprep.subr.bf16.mxu0 %v1055_v8  ;;  %758 = vmatprep.subr.bf16.mxu1 %v1055_v8 }
  0x7c   :  { %403 = vmatprep.mubr.f32.mxu1 %v338_v55  ;;  %330 = vmatprep.mubr.f32.mxu0 %v265_v56 }
  0x7e   :  { %696 = vmatpush1.bf16.msra.mxu0 %v1061_v13  ;;  %760 = vmatpush1.bf16.msra.mxu1 %v1061_v13 }
  0x7f   :  { %698 = vmatprep.subr.bf16.mxu0 %v1065_v14  ;;  %762 = vmatprep.subr.bf16.mxu1 %v1065_v14 }
  0x82   :  { %700 = vmatpush1.bf16.msra.mxu0 %v1069_v19  ;;  %764 = vmatpush1.bf16.msra.mxu1 %v1069_v19 }
  0x83   :  { %702 = vmatprep.subr.bf16.mxu0 %v1073_v20  ;;  %766 = vmatprep.subr.bf16.mxu1 %v1073_v20 }
  0x86   :  { %704 = vmatpush1.bf16.msra.mxu0 %v1077_v25  ;;  %768 = vmatpush1.bf16.msra.mxu1 %v1077_v25 }
  0x87   :  { %706 = vmatprep.subr.bf16.mxu0 %v1081_v26  ;;  %770 = vmatprep.subr.bf16.mxu1 %v1081_v26 }
  0x8a   :  { %708 = vmatpush1.bf16.msra.mxu0 %v1085_v31  ;;  %772 = vmatpush1.bf16.msra.mxu1 %v1085_v31 }
  0x8b   :  { %710 = vmatprep.subr.bf16.mxu0 %v1089_v32  ;;  %774 = vmatprep.subr.bf16.mxu1 %v1089_v32 }
  0x8e   :  { %712 = vmatpush1.bf16.msra.mxu0 %v1093_v37  ;;  %776 = vmatpush1.bf16.msra.mxu1 %v1093_v37 }
  0x8f   :  { %714 = vmatprep.subr.bf16.mxu0 %v1097_v39  ;;  %778 = vmatprep.subr.bf16.mxu1 %v1097_v39 }
  0x92   :  { %716 = vmatpush1.bf16.msra.mxu0 %v1107_v45  ;;  %780 = vmatpush1.bf16.msra.mxu1 %v1107_v45 }
  0x93   :  { %718 = vmatprep.subr.bf16.mxu0 %v1111_v46  ;;  %782 = vmatprep.subr.bf16.mxu1 %v1111_v46 }
  0x96   :  { %720 = vmatpush1.bf16.msra.mxu0 %v1115_v51  ;;  %784 = vmatpush1.bf16.msra.mxu1 %v1115_v51 }
  0x97   :  { %722 = vmatprep.subr.bf16.mxu0 %v1119_v52  ;;  %786 = vmatprep.subr.bf16.mxu1 %v1119_v52 }
  0x9a   :  { %724 = vmatpush1.bf16.msra.mxu0 %v1123_v57  ;;  %788 = vmatpush1.bf16.msra.mxu1 %v1123_v57 }
  0x9b   :  { %726 = vmatprep.subr.bf16.mxu0 %v1127_v58  ;;  %790 = vmatprep.subr.bf16.mxu1 %v1127_v58 }
  0x9e   :  { %728 = vmatpush1.bf16.msra.mxu0 %v1131_v63  ;;  %792 = vmatpush1.bf16.msra.mxu1 %v1131_v63 }
  0x9f   :  { %730 = vmatprep.subr.bf16.mxu0 %v1135_v0  ;;  %794 = vmatprep.subr.bf16.mxu1 %v1135_v0 }
  0xa2   :  { %732 = vmatpush1.bf16.msra.mxu0 %v1139_v6  ;;  %796 = vmatpush1.bf16.msra.mxu1 %v1139_v6 }
  0xa3   :  { %734 = vmatprep.subr.bf16.mxu0 %v1143_v9  ;;  %798 = vmatprep.subr.bf16.mxu1 %v1143_v9 }
  0xa6   :  { %736 = vmatpush1.bf16.msra.mxu0 %v1147_v16  ;;  %800 = vmatpush1.bf16.msra.mxu1 %v1147_v16 }
  0xa7   :  { %738 = vmatprep.subr.bf16.mxu0 %v1151_v17  ;;  %802 = vmatprep.subr.bf16.mxu1 %v1151_v17 }
  0xaa   :  { %740 = vmatpush1.bf16.msra.mxu0 %v1155_v24  ;;  %804 = vmatpush1.bf16.msra.mxu1 %v1155_v24 }
  0xab   :  { %742 = vmatprep.subr.bf16.mxu0 %v1159_v27  ;;  %806 = vmatprep.subr.bf16.mxu1 %v1159_v27 }
  0xae   :  { %744 = vmatpush1.bf16.msra.mxu0 %v1163_v34  ;;  %808 = vmatpush1.bf16.msra.mxu1 %v1163_v34 }
  0xaf   :  { %746 = vmatprep.subr.bf16.mxu0 %v1167_v35  ;;  %810 = vmatprep.subr.bf16.mxu1 %v1167_v35 }
  0xb2   :  { %748 = vmatpush1.bf16.msra.mxu0 %v1171_v44  ;;  %812 = vmatpush1.bf16.msra.mxu1 %v1171_v44 }
  0xb3   :  { %750 = vmatprep.subr.bf16.mxu0 %v1175_v47  ;;  %814 = vmatprep.subr.bf16.mxu1 %v1175_v47 }
  0xb6   :  { %752 = vmatpush1.bf16.msra.mxu0 %v1179_v50  ;;  %816 = vmatpush1.bf16.msra.mxu1 %v1179_v50 }
  0xb7   :  { %818 = vmatprep.subr.bf16.mxu0 %v1051_v3  ;;  %v262_v3 = vmul.f32 %v1185_v53, %v1185_v53 }
  0xb9   :  { %404 = vmatmul.mubr.f32.vlgmr.msra.gmra.mrb[2].mxu1 %v337_v59  ;;  %331 = vmatmul.mubr.f32.vlgmr.msra.gmra.mrb[2].mxu0 %v264_v42 }
  0xba   :  { %820 = vmatpush1.bf16.msra.mxu0 %v1053_v7  ;;  %496 = vmatprep.mubr.f32.mxu0 %v263_v60 }
  0xbb   :  { %822 = vmatprep.subr.bf16.mxu0 %v1055_v8 }
  0xbe   :  { %824 = vmatpush1.bf16.msra.mxu0 %v1061_v13 }
  0xbf   :  { %826 = vmatprep.subr.bf16.mxu0 %v1065_v14 }
  0xc2   :  { %828 = vmatpush1.bf16.msra.mxu0 %v1069_v19 }
  0xc3   :  { %830 = vmatprep.subr.bf16.mxu0 %v1073_v20 }
  0xc6   :  { %832 = vmatpush1.bf16.msra.mxu0 %v1077_v25 }
  0xc7   :  { %834 = vmatprep.subr.bf16.mxu0 %v1081_v26 }
  0xca   :  { %836 = vmatpush1.bf16.msra.mxu0 %v1085_v31 }
  0xcb   :  { %838 = vmatprep.subr.bf16.mxu0 %v1089_v32 }
  0xce   :  { %840 = vmatpush1.bf16.msra.mxu0 %v1093_v37 }
  0xcf   :  { %842 = vmatprep.subr.bf16.mxu0 %v1097_v39 }
  0xd2   :  { %844 = vmatpush1.bf16.msra.mxu0 %v1107_v45 }
  0xd3   :  { %846 = vmatprep.subr.bf16.mxu0 %v1111_v46 }
  0xd6   :  { %848 = vmatpush1.bf16.msra.mxu0 %v1115_v51 }
  0xd7   :  { %850 = vmatprep.subr.bf16.mxu0 %v1119_v52 }
  0xda   :  { %852 = vmatpush1.bf16.msra.mxu0 %v1123_v57 }
  0xdb   :  { %854 = vmatprep.subr.bf16.mxu0 %v1127_v58 }
  0xde   :  { %856 = vmatpush1.bf16.msra.mxu0 %v1131_v63 }
  0xdf   :  { %858 = vmatprep.subr.bf16.mxu0 %v1135_v0 }
  0xe2   :  { %860 = vmatpush1.bf16.msra.mxu0 %v1139_v6 }
  0xe3   :  { %862 = vmatprep.subr.bf16.mxu0 %v1143_v9 }
  0xe6   :  { %864 = vmatpush1.bf16.msra.mxu0 %v1147_v16 }
  0xe7   :  { %866 = vmatprep.subr.bf16.mxu0 %v1151_v17 }
  0xea   :  { %868 = vmatpush1.bf16.msra.mxu0 %v1155_v24 }
  0xeb   :  { %870 = vmatprep.subr.bf16.mxu0 %v1159_v27 }
  0xee   :  { %872 = vmatpush1.bf16.msra.mxu0 %v1163_v34 }
  0xef   :  { %874 = vmatprep.subr.bf16.mxu0 %v1167_v35 }
  0xf2   :  { %876 = vmatpush1.bf16.msra.mxu0 %v1171_v44 }
  0xf3   :  { %878 = vmatprep.subr.bf16.mxu0 %v1175_v47 }
  0xf6   :  { %880 = vmatpush1.bf16.msra.mxu0 %v1179_v50 }
  0xf9   :  { %497 = vmatmul.mubr.f32.vlgmr.msra.gmra.mrb[2].mxu0 %v262_v3 }
 0x14c   :  { %v186_v7 = vpop.f32.mrb[0].mxu0  ;;  %v257_v8 = vpop.f32.mrb[0].mxu1 }
 0x14d   :  { %v412_v13 = vmul.f32 %v186_v7, %v186_v7  ;;  %v410_v14 = vmul.f32 %v257_v8, %v186_v7  ;;  %v414_v19 = vmul.f32 %v257_v8, %v257_v8  ;;  %v188_v20 = vpop.f32.mrb[1].mxu0  ;;  %v259_v25 = vpop.f32.mrb[1].mxu1 }
 0x14e   :  { %v413_v26 = vmul.f32 %v188_v20, %v188_v20  ;;  %v411_v31 = vmul.f32 %v259_v25, %v188_v20  ;;  %v415_v32 = vmul.f32 %v259_v25, %v259_v25 }
 0x14f   :  { %v416_v37 = vadd.f32 %v414_v19, %v412_v13  ;;  %v418_v45 = vmul.f32 2.0, %v410_v14 }
 0x150   :  { %v417_v39 = vadd.f32 %v415_v32, %v413_v26  ;;  %v419_v52 = vmul.f32 2.0, %v411_v31 }
 0x151   :  { %v420_v62 = vadd.f32 0.0081, %v418_v45  ;;  %v430_v15 = vadd.f32 0.0081, %v416_v37 }
 0x152   :  { %v421_v0 = vadd.f32 0.0081, %v419_v52  ;;  %v431_v17 = vadd.f32 0.0081, %v417_v39 }
 0x18c   :  { %v405_v41 = vpop.f32.mrb[2].mxu1 }
 0x18d   :  { %v422_v46 = vmul.f32 18.0, %v405_v41  ;;  %v407_v51 = vpop.f32.mrb[3].mxu1 }
 0x18e   :  { %v423_v57 = vmul.f32 18.0, %v407_v51 }
 0x18f   :  { %v424_v58 = vsub.f32 %v422_v46, %v418_v45 }
 0x190   :  { %v425_v61 = vsub.f32 %v423_v57, %v419_v52 }
 0x191   :  { %v426_v63 = vadd.f32 0.0729, %v424_v58 }
 0x192   :  { %v427_v1 = vadd.f32 0.0729, %v425_v61 }
 0x193   :  { %v428_v2 = vmul.f32 %v426_v63, %v420_v62 }
 0x194   :  { %v429_v4 = vmul.f32 %v427_v1, %v421_v0 }
 0x195   :  { %v519_v34 = vmul.f32 0.5, %v428_v2 }
 0x196   :  { %v520_v35 = vmul.f32 0.5, %v429_v4 }
 0x1cc   :  { %v498_v5 = vpop.f32.mrb[2].mxu0 }
 0x1cd   :  { %v503_v6 = vmul.f32 9.0, %v498_v5  ;;  %v500_v9 = vpop.f32.mrb[3].mxu0 }
 0x1ce   :  { %v504_v10 = vmul.f32 9.0, %v500_v9 }
 0x1cf   :  { %v505_v11 = vsub.f32 %v503_v6, %v416_v37 }
 0x1d0   :  { %v506_v12 = vsub.f32 %v504_v10, %v417_v39 }
 0x1d1   :  { %v507_v16 = vadd.f32 0.0729, %v505_v11 }
 0x1d2   :  { %v508_v18 = vadd.f32 0.0729, %v506_v12 }
 0x1d3   :  { %v509_v21 = vmul.f32 %v507_v16, %v430_v15 }
 0x1d4   :  { %v510_v22 = vmul.f32 %v508_v18, %v431_v17 }
 0x1d5   :  { %891 = vrcp.f32 %v509_v21 }
 0x1d6   :  { %893 = vrcp.f32 %v510_v22 }
 0x1df   :  { %v892_v23 = vpop.eup %891 }
 0x1e0   :  { %v894_v24 = vpop.eup %893  ;;  %v513_v27 = vmul.f32 %v892_v23, %v509_v21 }
 0x1e1   :  { %v514_v28 = vmul.f32 %v894_v24, %v510_v22 }
 0x1e2   :  { %v515_v29 = vsub.f32 2.0, %v513_v27 }
 0x1e3   :  { %v516_v30 = vsub.f32 2.0, %v514_v28 }
 0x1e4   :  { %v517_v33 = vmul.f32 %v892_v23, %v515_v29 }
 0x1e5   :  { %v518_v36 = vmul.f32 %v894_v24, %v516_v30 }
 0x1e6   :  { %v521_v38 = vmul.f32 %v519_v34, %v517_v33 }
 0x1e7   :  { %v522_v40 = vmul.f32 %v520_v35, %v518_v36 }
 0x1e8   :  { %v523_v43 = vsub.f32 0.5, %v521_v38 }
 0x1e9   :  { %v524_v44 = vsub.f32 0.5, %v522_v40 }
 0x1ea   :  { %v525_v47 = vmax.f32 %v523_v43, 0.0 }
 0x1eb   :  { %v526_v48 = vmax.f32 %v524_v44, 0.0 }
 0x1ec   :  { %v527_v49 = vmin.f32 %v525_v47, 1.0 }
 0x1ed   :  { %v528_v50 = vmin.f32 %v526_v48, 1.0 }
 0x1ef   :  { %v529_v53 = vadd.f32 %v528_v50, %v527_v49 }
 0x1f1   :  { %530 = vadd.xlane.f32.xlu0 %v529_v53 }
 0x27e   :  { %v531_v54 = vpop.xlane.xlu0 %530 }
 0x27f   :  { %v533_v55 = vsel %vm532_vm0, %v531_v54, 0.0 }
 0x280   :  { %534 = vadd.xlane.f32.xlu0 %v533_v55 }
 0x30d   :  { %v535_v56 = vpop.xlane.xlu0 %534 }
 0x30e   :  { %v536_v42 = vrot.slane %v535_v56, 4 }
 0x310   :  { %v537_v59 = vadd.f32 %v536_v42, %v535_v56 }
 0x312   :  { %v538_v60 = vrot.slane %v537_v59, 2 }
 0x314   :  { %v539_v3 = vadd.f32 %v538_v60, %v537_v59 }
 0x316   :  { %v540_v7 = vrot.slane %v539_v3, 1 }
 0x318   :  { %v541_v8 = vadd.f32 %v540_v7, %v539_v3 }
 0x31a   :  { %883 = vpush %v541_v8 }
 0x34b   :  { %s884_s22 = spop %883 }
 0x34c   :  { %v543_v13 = vstv %s884_s22 }
 0x34d   :  { %544 = vst [vmem:[#allocation8] sm:$0xff] %v543_v13 }
 0x34e   :  { %972 = shalt.err (!%p969_p0)
}
 0x34f   :  { %s973_s26 = scalar_lea.hbm %s1314_s3, 128 }
 0x350   :  { %p974_p1 = scmp.ne.s32.totalorder %s1314_s3, %s973_s26  ;;  %p977_p2 = scmp.lt.u32.totalorder %s973_s26, %s1314_s3 }
 0x352   :  { %p979_p3 = pnand %p977_p2, %p974_p1 }
 0x354   :  { %982 = shalt.err (!%p979_p3)
}
 0x355   :  { %554 = dma.vmem_to_hbm [thread:$0]  %s552_s21, 128, %s1314_s3, [#allocation4]  }
 0x356   :  { %987 = dma.done.wait [#allocation4], 128  }
 0x357   :  { %988 = vsyncadd [#allocation4], 4294967168 }
 0x358   :  { %558 = vsyncpa [#allocation3], 1 }
 0x359   :  { %559 = vsyncpa [#allocation6], 1 }
 0x35a   :  { %560 = vsyncpa [#allocation4], 1 }

</bundles_post_ra>
